<compile_context>
chip_gen: v7x
topology: tpu7x:2x2x1
jax: 0.10.0
libtpu: 0.0.40
codegen_flags: <defaults>
</compile_context>

<pallas_src>
import jax
import jax.numpy as jnp
from jax.experimental import pallas as pl
from jax.experimental.pallas import tpu as pltpu


def _dual_head_kernel(x_ref, w_ref, b_ref, out_ref):
    # One fused MXU matmul for both heads; f32 accumulate, bias add on the VPU.
    acc = jnp.dot(x_ref[...], w_ref[...], preferred_element_type=jnp.float32)
    out_ref[...] = (acc + b_ref[...]).astype(out_ref.dtype)


def _pick_batch_tile(B, D, Lp, itemsize,
                     budget_bytes=40 * 1024 * 1024, max_tile=1024):
    """Largest batch tile (multiple of 8) whose double-buffered VMEM footprint
    stays under `budget_bytes` (safe for v7x's 64 MiB VMEM)."""
    b_pad8 = ((B + 7) // 8) * 8
    fixed = 2 * (D * Lp + Lp) * itemsize            # fused weight + bias buffers
    per_row = 2 * (D + Lp) * itemsize               # x tile + out tile, double-buffered
    tb = max_tile
    while tb > 8 and fixed + tb * per_row > budget_bytes:
        tb //= 2
    return min(max(tb, 8), b_pad8)


def dual_head_probe(x, w1, b1, w2, b2):
    """x: (B, D); w1/w2: (D, L); b1/b2: (L,). Returns (presence, truth), each (B, L)."""
    B, D = x.shape
    L = w1.shape[1]
    out_dtype = x.dtype
    itemsize = x.dtype.itemsize

    # --- Fuse the two heads and pad the label axis to a lane-dense 128-multiple.
    lp = max(128, pl.cdiv(2 * L, 128) * 128)
    w = jnp.zeros((D, lp), dtype=w1.dtype)
    w = w.at[:, :L].set(w1).at[:, L:2 * L].set(w2)
    b = jnp.zeros((1, lp), dtype=b1.dtype)
    b = b.at[0, :L].set(b1).at[0, L:2 * L].set(b2)

    # --- Tile the batch axis; pad B to a multiple of the tile (multiple of 8).
    tb = _pick_batch_tile(B, D, lp, itemsize)
    bp = pl.cdiv(B, tb) * tb
    if bp != B:
        x = jnp.pad(x, ((0, bp - B), (0, 0)))

    grid_spec = pl.GridSpec(
        grid=(bp // tb,),
        in_specs=[
            pl.BlockSpec((tb, D), lambda i: (i, 0)),   # streamed activation tiles
            pl.BlockSpec((D, lp), lambda i: (0, 0)),   # resident fused weight
            pl.BlockSpec((1, lp), lambda i: (0, 0)),   # resident fused bias
        ],
        out_specs=pl.BlockSpec((tb, lp), lambda i: (i, 0)),
    )

    flops = 2 * bp * D * lp
    bytes_accessed = (bp * D + D * lp + lp + bp * lp) * itemsize

    out = pl.pallas_call(
        _dual_head_kernel,
        out_shape=jax.ShapeDtypeStruct((bp, lp), out_dtype),
        grid_spec=grid_spec,
        compiler_params=pltpu.CompilerParams(
            dimension_semantics=("parallel",),          # shard batch over v7x's 2 TCs
            vmem_limit_bytes=48 * 1024 * 1024,          # fits v7x 64 MiB physical VMEM
        ),
        cost_estimate=pl.CostEstimate(
            flops=flops, transcendentals=0, bytes_accessed=bytes_accessed),
    )(x, w, b)

    # Split the fused, padded output back into the two heads.
    presence = out[:B, :L]
    truth = out[:B, L:2 * L]
    return presence, truth


def _init_params(key, input_dim, num_labels, dtype=jnp.float32):
    # Deterministic synthetic init (mimics nn.Linear's uniform(-1/sqrt(D), 1/sqrt(D))).
    k1, k2, k3, k4 = jax.random.split(key, 4)
    bound = 1.0 / jnp.sqrt(jnp.array(input_dim, dtype))
    w1 = jax.random.uniform(k1, (input_dim, num_labels), dtype, -bound, bound)
    b1 = jax.random.uniform(k2, (num_labels,), dtype, -bound, bound)
    w2 = jax.random.uniform(k3, (input_dim, num_labels), dtype, -bound, bound)
    b2 = jax.random.uniform(k4, (num_labels,), dtype, -bound, bound)
    return w1, b1, w2, b2


if __name__ == "__main__":
    key = jax.random.PRNGKey(0)
    kx, kp = jax.random.split(key)

    # B deliberately not a multiple of 8 to exercise the batch-padding path.
    batch, input_dim, num_labels = 20, 32, 16
    x = jax.random.normal(kx, (batch, input_dim), jnp.float32)
    w1, b1, w2, b2 = _init_params(kp, input_dim, num_labels)

    presence, truth = dual_head_probe(x, w1, b1, w2, b2)
    jax.block_until_ready((presence, truth))

    # Reference check against plain JAX (== the nn.Linear forward).
    ref_presence = x @ w1 + b1
    ref_truth = x @ w2 + b2
    assert presence.shape == (batch, num_labels)
    assert truth.shape == (batch, num_labels)
    assert jnp.allclose(presence, ref_presence, atol=1e-5, rtol=1e-5)
    assert jnp.allclose(truth, ref_truth, atol=1e-5, rtol=1e-5)

    print("KERNEL_OK")
</pallas_src>

<mosaic_0001>
module attributes {stable_mosaic.version = 11 : i64} {
  func.func @_dual_head_kernel(%arg0: i32, %arg1: memref<24x32xf32, #tpu.memory_space<vmem>>, %arg2: memref<32x128xf32, #tpu.memory_space<vmem>>, %arg3: memref<1x128xf32, #tpu.memory_space<vmem>>, %arg4: memref<24x128xf32, #tpu.memory_space<vmem>>) attributes {dimension_semantics = [#tpu.dimension_semantics<parallel>], iteration_bounds = array<i64: 1>, scalar_prefetch = 0 : i64, scratch_operands = 0 : i64, tpu.core_type = #tpu.core_type<tc>, window_params = [{transform_indices = @transform_0, window_bounds = array<i64: 24, 32>}, {pipeline_mode = #tpu.pipeline_mode<synchronous>, transform_indices = @transform_1, window_bounds = array<i64: 32, 128>}, {pipeline_mode = #tpu.pipeline_mode<synchronous>, transform_indices = @transform_2, window_bounds = array<i64: 1, 128>}, {transform_indices = @transform_3, window_bounds = array<i64: 24, 128>}]} {
    %c0 = arith.constant 0 : index
    %c0_0 = arith.constant 0 : index
    %0 = vector.load %arg1[%c0, %c0_0] : memref<24x32xf32, #tpu.memory_space<vmem>>, vector<24x32xf32>
    %c0_1 = arith.constant 0 : index
    %c0_2 = arith.constant 0 : index
    %1 = vector.load %arg2[%c0_1, %c0_2] : memref<32x128xf32, #tpu.memory_space<vmem>>, vector<32x128xf32>
    %cst = arith.constant dense<0.000000e+00> : vector<24x128xf32>
    %2 = tpu.matmul %0, %1, %cst {dimension_numbers = #tpu.dot_dimension_numbers<[1], [0], [0], [1], [0, 0, 1, 1], [], []>} : vector<24x32xf32>, vector<32x128xf32>, vector<24x128xf32> -> vector<24x128xf32>
    %c0_3 = arith.constant 0 : index
    %c0_4 = arith.constant 0 : index
    %3 = vector.load %arg3[%c0_3, %c0_4] : memref<1x128xf32, #tpu.memory_space<vmem>>, vector<1x128xf32>
    %4 = vector.broadcast %3 : vector<1x128xf32> to vector<24x128xf32>
    %5 = arith.addf %2, %4 : vector<24x128xf32>
    %c0_5 = arith.constant 0 : index
    %c0_6 = arith.constant 0 : index
    %6 = vector.load %arg4[%c0_5, %c0_6] : memref<24x128xf32, #tpu.memory_space<vmem>>, vector<24x128xf32>
    tpu.vector_store %arg4[%c0_5, %c0_6], %5 {strides = array<i32>} : memref<24x128xf32, #tpu.memory_space<vmem>>, vector<24x128xf32>,
    return
  }
  func.func @transform_0(%arg0: i32) -> (i32, i32) {
    %c0_i32 = arith.constant 0 : i32
    %c0_i32_0 = arith.constant 0 : i32
    return %arg0, %c0_i32 : i32, i32
  }
  func.func @transform_1(%arg0: i32) -> (i32, i32) {
    %c0_i32 = arith.constant 0 : i32
    %c0_i32_0 = arith.constant 0 : i32
    %c0_i32_1 = arith.constant 0 : i32
    return %c0_i32, %c0_i32_0 : i32, i32
  }
  func.func @transform_2(%arg0: i32) -> (i32, i32) {
    %c0_i32 = arith.constant 0 : i32
    %c0_i32_0 = arith.constant 0 : i32
    %c0_i32_1 = arith.constant 0 : i32
    return %c0_i32, %c0_i32_0 : i32, i32
  }
  func.func @transform_3(%arg0: i32) -> (i32, i32) {
    %c0_i32 = arith.constant 0 : i32
    %c0_i32_0 = arith.constant 0 : i32
    return %arg0, %c0_i32 : i32, i32
  }
}

</mosaic_0001>

<bundles_post_ra>
// kernel: tpu_custom_call.1
= control target key start
LH: loop header
LB: loop body
LE: loop exit
PB: predicated region body
PF: predicated region fallthrough
CT: control target
= control target key end

     0   :  { %8 = vsyncpa [#allocation3], 0  ;;  %s365_s0 = inlined_call_operand.hbm [shape: f32[24,32], index: 0, kind: input, shape index: {}]   ;;  %s366_s1 = inlined_call_operand.hbm [shape: f32[32,128], index: 1, kind: input, shape index: {}]   ;;  %s367_s2 = inlined_call_operand.vmem [shape: f32[1,128], index: 2, kind: input, shape index: {}]   ;;  %s368_s3 = inlined_call_operand.hbm [shape: f32[24,128], index: 3, kind: output, shape index: {}]  }
   0x1   :  { %9 = vsyncpa [#allocation6], 0 }
   0x2   :  { %10 = vsyncpa [#allocation4], 0  ;;  %s286_s12 = smov [#allocation2]   ;;  %s214_s16 = scalar_lea.hbm %s365_s0, 384 }
   0x3   :  { %s16_s13 = sshll.u32 %s286_s12, 4  ;;  %p215_p0 = scmp.ne.s32.totalorder %s365_s0, %s214_s16  ;;  %s17_s13 = int_to_ptr.vmem [resolvable:$true] %s16_s13 }
   0x4   :  { %p218_p1 = scmp.lt.u32.totalorder %s214_s16, %s365_s0 }
   0x6   :  { %p220_p2 = pnand %p218_p1, %p215_p0 }
   0x8   :  { %223 = shalt.err (!%p220_p2)
}
   0x9   :  { %s224_s21 = scalar_lea.vmem %s17_s13, 384  ;;  %p229_p4 = scmp.lt.s32.totalorder %s17_s13, %s17_s13 }
   0xa   :  { %p225_p3 = scmp.ne.s32.totalorder %s17_s13, %s224_s21  ;;  %p230_p5 = scmp.lt.s32.totalorder %s224_s21, %s224_s21 }
   0xc   :  { %p231_p6 = por %p230_p5, %p229_p4 }
   0xe   :  { %p232_p7 = pnand %p231_p6, %p225_p3 }
  0x10   :  { %235 = shalt.err (!%p232_p7)
}
  0x11   :  { %s287_s22 = smov 128   ;;  %s288_s23 = smov 8  }
  0x12   :  { %22 = dma.hbm_to_vmem [thread:$0]  %s365_s0, 384, %s17_s13, [#allocation3], %s287_s22, %s287_s22, %s288_s23  }
  0x13   :  { %s289_s26 = smov [#allocation5]   ;;  %s236_s30 = scalar_lea.hbm %s366_s1, 512 }
  0x14   :  { %s28_s27 = sshll.u32 %s289_s26, 4  ;;  %p237_p8 = scmp.ne.s32.totalorder %s366_s1, %s236_s30  ;;  %s29_s27 = int_to_ptr.vmem [resolvable:$true] %s28_s27 }
  0x15   :  { %p240_p9 = scmp.lt.u32.totalorder %s236_s30, %s366_s1 }
  0x17   :  { %p242_p10 = pnand %p240_p9, %p237_p8 }
  0x19   :  { %245 = shalt.err (!%p242_p10)
}
  0x1a   :  { %s246_s8 = scalar_lea.vmem %s29_s27, 512  ;;  %p251_p12 = scmp.lt.s32.totalorder %s29_s27, %s29_s27 }
  0x1b   :  { %p247_p11 = scmp.ne.s32.totalorder %s29_s27, %s246_s8  ;;  %p252_p13 = scmp.lt.s32.totalorder %s246_s8, %s246_s8 }
  0x1d   :  { %p253_p0 = por %p252_p13, %p251_p12 }
  0x1f   :  { %p254_p1 = pnand %p253_p0, %p247_p11 }
  0x21   :  { %257 = shalt.err (!%p254_p1)
}
  0x22   :  { %34 = dma.hbm_to_vmem [thread:$0]  %s366_s1, 512, %s29_s27, [#allocation6], %s287_s22, %s287_s22, %s288_s23  }
  0x23   :  { %280 = dma.done.wait [#allocation3], 384  }
  0x24   :  { %281 = vsyncadd [#allocation3], 4294966912 }
  0x25   :  { %282 = dma.done.wait [#allocation6], 512  }
  0x26   :  { %283 = vsyncadd [#allocation6], 4294966784  ;;  %v290_v0 = vmov 0.0|0.0   ;;  %vm291_vm0 = vmmov 0   ;;  %v292_v1 = vmov 0.0   ;;  %v46_v2 = vld [vmem:[#allocation5] sm:$0xff] }
  0x27   :  { %202 = vmatprep.subr.bf16.mxu1 %v290_v0  ;;  %196 = vmatprep.subr.bf16.mxu0 %v290_v0  ;;  %v47_v3 = vld [vmem:[#allocation5 + $0x8] sm:$0xff]  ;;  %v48_v4 = vld [vmem:[#allocation5 + $0x10] sm:$0xff]  ;;  %v49_v6 = vld [vmem:[#allocation5 + $0x18] sm:$0xff]  ;;  %vm57_vm1 = vcmask 261120   ;;  %s293_s11 = smov [#allocation7]  }
  0x28   :  { %190 = vmatprep.mubr.msk.f32.mxu1 %vm291_vm0, %v292_v1  ;;  %187 = vmatprep.mubr.msk.f32.mxu0 %vm291_vm0, %v292_v1  ;;  %v197_v5 = vpack.c.bf16 %v47_v3, %v46_v2  ;;  %v200_v7 = vpack.c.bf16 %v49_v6, %v48_v4  ;;  %v44_v8 = vld [vmem:[#allocation2 + $0x8] sm:$0xff]  ;;  %v43_v9 = vld [vmem:[#allocation2] sm:$0xff]  ;;  %v45_v10 = vld [vmem:[#allocation2 + $0x10] sm:$0xff]  ;;  %s155_s12 = sshll.u32 %s293_s11, 4  ;;  %s156_s12 = int_to_ptr.vmem [resolvable:$true] %s155_s12 }
  0x29   :  { %v168_v11 = vld [vmem:[%s367_s2] ss:$0 sm:$0xff]  ;;  %s258_s13 = scalar_lea.vmem %s156_s12, 384  ;;  %p263_p3 = scmp.lt.s32.totalorder %s156_s12, %s156_s12 }
  0x2a   :  { %204 = vmatpush3.bf16.msra.mxu1 %v197_v5  ;;  %198 = vmatpush3.bf16.msra.mxu0 %v197_v5  ;;  %p259_p2 = scmp.ne.s32.totalorder %s156_s12, %s258_s13  ;;  %p264_p4 = scmp.lt.s32.totalorder %s258_s13, %s258_s13 }
  0x2b   :  { %203 = vmatprep.subr.bf16.mxu1 %v290_v0  ;;  %199 = vmatprep.subr.bf16.mxu0 %v290_v0 }
  0x2c   :  { %p265_p5 = por %p264_p4, %p263_p3 }
  0x2e   :  { %205 = vmatpush3.bf16.msra.mxu1 %v200_v7  ;;  %201 = vmatpush3.bf16.msra.mxu0 %v200_v7  ;;  %p266_p6 = pnand %p265_p5, %p259_p2 }
  0x31   :  { %191 = vmatmul.mubr.msk.f32.vlgmr.msra.gmra.mrb[0].mxu1 %vm57_vm1, %v44_v8  ;;  %188 = vmatmul.mubr.msk.f32.vlgmr.msra.gmra.mrb[0].mxu0 %vm57_vm1, %v43_v9 }
  0x32   :  { %193 = vmatprep.mubr.msk.f32.mxu1 %vm291_vm0, %v292_v1 }
  0x35   :  { %194 = vmatmul.mubr.msk.f32.gmra.mrb[2].mxu1 %vm57_vm1, %v45_v10 }
 0x104   :  { %v138_v12 = vpop.f32.mrb[0].mxu1  ;;  %v133_v13 = vpop.f32.mrb[0].mxu0 }
 0x105   :  { %v139_v14 = vadd.f32 %v168_v11, %v138_v12  ;;  %v192_v15 = vpop.f32.mrb[1].mxu1  ;;  %v134_v16 = vadd.f32 %v168_v11, %v133_v13  ;;  %v189_v17 = vpop.f32.mrb[1].mxu0 }
 0x107   :  { %148 = vst [vmem:[#allocation7 + $0x8] sm:$0xff] %v139_v14  ;;  %147 = vst [vmem:[#allocation7] sm:$0xff] %v134_v16 }
 0x108   :  { %v143_v18 = vpop.f32.mrb[2].mxu1 }
 0x109   :  { %v144_v19 = vadd.f32 %v168_v11, %v143_v18  ;;  %v195_v20 = vpop.f32.mrb[3].mxu1 }
 0x10b   :  { %149 = vst [vmem:[#allocation7 + $0x10] sm:$0xff] %v144_v19 }
 0x10c   :  { %269 = shalt.err (!%p266_p6)
}
 0x10d   :  { %s270_s15 = scalar_lea.hbm %s368_s3, 384 }
 0x10e   :  { %p271_p7 = scmp.ne.s32.totalorder %s368_s3, %s270_s15  ;;  %p274_p8 = scmp.lt.u32.totalorder %s270_s15, %s368_s3 }
 0x110   :  { %p276_p9 = pnand %p274_p8, %p271_p7 }
 0x112   :  { %279 = shalt.err (!%p276_p9)
}
 0x113   :  { %161 = dma.vmem_to_hbm [thread:$0]  %s156_s12, 384, %s368_s3, [#allocation4], %s287_s22, %s287_s22, %s288_s23  }
 0x114   :  { %284 = dma.done.wait [#allocation4], 384  }
 0x115   :  { %285 = vsyncadd [#allocation4], 4294966912 }
 0x116   :  { %165 = vsyncpa [#allocation3], 1 }
 0x117   :  { %166 = vsyncpa [#allocation6], 1 }
 0x118   :  { %167 = vsyncpa [#allocation4], 1 }

</bundles_post_ra>
